<compile_context>
chip_gen: v7x
topology: tpu7x:2x2x1
jax: 0.10.0
libtpu: 0.0.40
codegen_flags: <defaults>
</compile_context>

<pallas_src>
import functools
import math

import jax
import jax.numpy as jnp
from jax import lax
from jax.experimental import pallas as pl
from jax.experimental.pallas import tpu as pltpu

block_size = 36
n_embd = 64


def mha_kernel(x_ref, wqkv_ref, wp_ref, bp_ref, o_ref, *,
               num_heads, head_size, seq_len, blk_b, d_pad):
    """Grid = (B // blk_b,). One step handles blk_b batch elements, all heads fused."""
    M = blk_b * seq_len
    x = x_ref[...]                                          # (M, C)

    # Single fused QKV matmul: (M, C) @ (C, 3*Dp) -> (M, 3*Dp).
    # Each Dp=128-lane segment is [real D columns | zero padding] -> slices are
    # vreg-aligned.  The sqrt(C) scale is already folded into the Q columns.
    qkv = jnp.dot(x, wqkv_ref[...], preferred_element_type=jnp.float32)
    q_all = qkv[:, 0 * d_pad:1 * d_pad].reshape(blk_b, seq_len, d_pad)
    k_all = qkv[:, 1 * d_pad:2 * d_pad].reshape(blk_b, seq_len, d_pad)
    v_all = qkv[:, 2 * d_pad:3 * d_pad].reshape(blk_b, seq_len, d_pad)

    row = lax.broadcasted_iota(jnp.int32, (seq_len, seq_len), 0)
    col = lax.broadcasted_iota(jnp.int32, (seq_len, seq_len), 1)
    causal = (row >= col)[None]                             # (1, T, T), tril != 0

    head_outs = []
    for h in range(num_heads):                              # static, unrolled
        lo, hi = h * head_size, (h + 1) * head_size
        q = q_all[:, :, lo:hi]                              # (b, T, hs)
        k = k_all[:, :, lo:hi]
        v = v_all[:, :, lo:hi]

        # Contract on hs directly (no k transpose / relayout).
        scores = jnp.einsum('btd,bsd->bts', q, k,
                            preferred_element_type=jnp.float32)   # (b, T, T)
        scores = jnp.where(causal, scores, -jnp.inf)

        m = jnp.max(scores, axis=-1, keepdims=True)
        p = jnp.exp(scores - m)
        wei = p * pl.reciprocal(jnp.sum(p, axis=-1, keepdims=True), approx=False)

        head_outs.append(jnp.einsum('bts,bsd->btd', wei, v,
                                    preferred_element_type=jnp.float32))

    # "concat heads" -> (M, H*hs); reshape merges (b, T) back into rows.
    cat = jnp.concatenate(head_outs, axis=-1).reshape(M, num_heads * head_size)

    # Fused projection: (M, D) @ (D, n_embd) + bias.
    out = jnp.dot(cat, wp_ref[...], preferred_element_type=jnp.float32) + bp_ref[...]
    o_ref[...] = out.astype(o_ref.dtype)


def multi_head_attention(x, wq, wk, wv, w_proj, b_proj, *, target_rows=128):
    """x: (B, T, C); wq/wk/wv: (H, C, hs); w_proj: (H, hs, n_embd); b_proj: (1, n_embd)."""
    B, T, C = x.shape
    H, _, hs = wq.shape
    D = H * hs
    Dp = ((D + 127) // 128) * 128            # pad each QKV segment to 128 lanes
    assert T <= block_size

    # Batch elements per grid step: fold rows into the matmul M dimension
    # (target ~128 rows/step; keep block_b a divisor of B so every block is full).
    blk_b = min(B, max(1, target_rows // T))
    while B % blk_b != 0:
        blk_b -= 1
    grid_steps = B // blk_b

    # Wrapper-side weight stacking (lane-dense; head-concat ordering matches
    # torch.cat over heads).  sqrt(C) folded into Q; segments padded to Dp lanes.
    scale = float(C) ** 0.5                                    # matches PyTorch source
    wq_full = jnp.transpose(wq, (1, 0, 2)).reshape(C, D) * scale
    wk_full = jnp.transpose(wk, (1, 0, 2)).reshape(C, D)
    wv_full = jnp.transpose(wv, (1, 0, 2)).reshape(C, D)

    def pad_seg(w):
        return jnp.pad(w, ((0, 0), (0, Dp - D)))

    wqkv = jnp.concatenate([pad_seg(wq_full), pad_seg(wk_full), pad_seg(wv_full)],
                           axis=1)                             # (C, 3*Dp)
    wp_full = w_proj.reshape(D, n_embd)                        # (H*hs, n_embd)

    x2 = x.reshape(B * T, C)                                   # rows = (b, t) flattened

    kernel = functools.partial(mha_kernel, num_heads=H, head_size=hs,
                               seq_len=T, blk_b=blk_b, d_pad=Dp)

    out = pl.pallas_call(
        kernel,
        out_shape=jax.ShapeDtypeStruct((B * T, n_embd), x.dtype),
        grid_spec=pltpu.PrefetchScalarGridSpec(
            num_scalar_prefetch=0,
            grid=(grid_steps,),
            in_specs=[
                pl.BlockSpec((blk_b * T, C), lambda i: (i, 0)),    # x rows (per step)
                pl.BlockSpec((C, 3 * Dp), lambda i: (0, 0)),       # Wqkv (resident)
                pl.BlockSpec((D, n_embd), lambda i: (0, 0)),       # Wproj (resident)
                pl.BlockSpec((1, n_embd), lambda i: (0, 0)),       # bproj (resident)
            ],
            out_specs=pl.BlockSpec((blk_b * T, n_embd), lambda i: (i, 0)),
        ),
        compiler_params=pltpu.CompilerParams(
            dimension_semantics=("parallel",)),
    )(x2, wqkv, wp_full, b_proj)

    return out.reshape(B, T, n_embd)


def reference(x, wq, wk, wv, w_proj, b_proj):
    """Pure-JAX reference matching the PyTorch forward (eval mode)."""
    B, T, C = x.shape
    H, _, hs = wq.shape
    outs = []
    tril = jnp.tril(jnp.ones((T, T), dtype=bool))
    for h in range(H):
        q = x @ wq[h]
        k = x @ wk[h]
        v = x @ wv[h]
        wei = (q @ jnp.swapaxes(k, -2, -1)) * (C ** 0.5)
        wei = jnp.where(tril, wei, -jnp.inf)
        wei = jax.nn.softmax(wei, axis=-1)
        outs.append(wei @ v)
    cat = jnp.concatenate(outs, axis=-1)                               # (B, T, H*hs)
    wp_full = jnp.concatenate([w_proj[h] for h in range(H)], axis=0)   # (H*hs, n_embd)
    return cat @ wp_full + b_proj[0]


if __name__ == "__main__":
    B, T = 2, 8
    num_heads, head_size = 4, 16
    C = n_embd

    key = jax.random.PRNGKey(0)
    k_x, k_q, k_k, k_v, k_p, k_b = jax.random.split(key, 6)

    scale_in = 1.0 / math.sqrt(C)
    scale_cat = 1.0 / math.sqrt(num_heads * head_size)

    x = jax.random.normal(k_x, (B, T, C), dtype=jnp.float32)
    wq = jax.random.normal(k_q, (num_heads, C, head_size), dtype=jnp.float32) * scale_in
    wk = jax.random.normal(k_k, (num_heads, C, head_size), dtype=jnp.float32) * scale_in
    wv = jax.random.normal(k_v, (num_heads, C, head_size), dtype=jnp.float32) * scale_in
    w_proj = jax.random.normal(k_p, (num_heads, head_size, n_embd), dtype=jnp.float32) * scale_cat
    b_proj = jax.random.normal(k_b, (1, n_embd), dtype=jnp.float32) * 0.01

    out = multi_head_attention(x, wq, wk, wv, w_proj, b_proj)
    out = jax.block_until_ready(out)

    ref = reference(x, wq, wk, wv, w_proj, b_proj)
    assert out.shape == (B, T, n_embd)
    assert jnp.allclose(out, ref, atol=1e-4, rtol=1e-4), (
        f"max abs err = {jnp.max(jnp.abs(out - ref))}")

    print("KERNEL_OK")
</pallas_src>

<mosaic_0001>
module attributes {stable_mosaic.version = 11 : i64} {
  func.func @mha_kernel(%arg0: i32, %arg1: memref<16x64xf32, #tpu.memory_space<vmem>>, %arg2: memref<64x384xf32, #tpu.memory_space<vmem>>, %arg3: memref<64x64xf32, #tpu.memory_space<vmem>>, %arg4: memref<1x64xf32, #tpu.memory_space<vmem>>, %arg5: memref<16x64xf32, #tpu.memory_space<vmem>>) attributes {dimension_semantics = [#tpu.dimension_semantics<parallel>], iteration_bounds = array<i64: 1>, scalar_prefetch = 0 : i64, scratch_operands = 0 : i64, tpu.core_type = #tpu.core_type<tc>, window_params = [{transform_indices = @transform_0, window_bounds = array<i64: 16, 64>}, {pipeline_mode = #tpu.pipeline_mode<synchronous>, transform_indices = @transform_1, window_bounds = array<i64: 64, 384>}, {pipeline_mode = #tpu.pipeline_mode<synchronous>, transform_indices = @transform_2, window_bounds = array<i64: 64, 64>}, {pipeline_mode = #tpu.pipeline_mode<synchronous>, transform_indices = @transform_3, window_bounds = array<i64: 1, 64>}, {transform_indices = @transform_4, window_bounds = array<i64: 16, 64>}]} {
    %c0 = arith.constant 0 : index
    %c0_0 = arith.constant 0 : index
    %0 = vector.load %arg1[%c0, %c0_0] : memref<16x64xf32, #tpu.memory_space<vmem>>, vector<16x64xf32>
    %c0_1 = arith.constant 0 : index
    %c0_2 = arith.constant 0 : index
    %1 = vector.load %arg2[%c0_1, %c0_2] : memref<64x384xf32, #tpu.memory_space<vmem>>, vector<64x384xf32>
    %cst = arith.constant dense<0.000000e+00> : vector<16x384xf32>
    %2 = tpu.matmul %0, %1, %cst {dimension_numbers = #tpu.dot_dimension_numbers<[1], [0], [0], [1], [0, 0, 1, 1], [], []>} : vector<16x64xf32>, vector<64x384xf32>, vector<16x384xf32> -> vector<16x384xf32>
    %3 = vector.extract_strided_slice %2 {offsets = [0, 0], sizes = [16, 128], strides = [1, 1]} : vector<16x384xf32> to vector<16x128xf32>
    %4 = vector.shape_cast %3 : vector<16x128xf32> to vector<2x8x128xf32>
    %5 = vector.extract_strided_slice %2 {offsets = [0, 128], sizes = [16, 128], strides = [1, 1]} : vector<16x384xf32> to vector<16x128xf32>
    %6 = vector.shape_cast %5 : vector<16x128xf32> to vector<2x8x128xf32>
    %7 = vector.extract_strided_slice %2 {offsets = [0, 256], sizes = [16, 128], strides = [1, 1]} : vector<16x384xf32> to vector<16x128xf32>
    %8 = vector.shape_cast %7 : vector<16x128xf32> to vector<2x8x128xf32>
    %9 = tpu.iota {dimensions = array<i32: 0>} : vector<8x8xi32>
    %10 = tpu.iota {dimensions = array<i32: 1>} : vector<8x8xi32>
    %11 = arith.cmpi sge, %9, %10 : vector<8x8xi32>
    %12 = vector.shape_cast %11 : vector<8x8xi1> to vector<1x8x8xi1>
    %13 = vector.extract_strided_slice %4 {offsets = [0, 0, 0], sizes = [2, 8, 16], strides = [1, 1, 1]} : vector<2x8x128xf32> to vector<2x8x16xf32>
    %14 = vector.extract_strided_slice %6 {offsets = [0, 0, 0], sizes = [2, 8, 16], strides = [1, 1, 1]} : vector<2x8x128xf32> to vector<2x8x16xf32>
    %15 = vector.extract_strided_slice %8 {offsets = [0, 0, 0], sizes = [2, 8, 16], strides = [1, 1, 1]} : vector<2x8x128xf32> to vector<2x8x16xf32>
    "tpu.trace_start"() <{level = 10 : i32, message = "btd,bsd->bts"}> : () -> ()
    %cst_3 = arith.constant dense<0.000000e+00> : vector<2x8x8xf32>
    %16 = tpu.matmul %13, %14, %cst_3 {dimension_numbers = #tpu.dot_dimension_numbers<[2], [2], [1], [1], [0, 0, 0, 1, 1, 1], [0], [0]>} : vector<2x8x16xf32>, vector<2x8x16xf32>, vector<2x8x8xf32> -> vector<2x8x8xf32>
    %cst_4 = arith.constant 0xFF800000 : f32
    "tpu.trace_stop"() : () -> ()
    %17 = vector.shape_cast %12 : vector<1x8x8xi1> to vector<1x8x8xi1>
    %18 = vector.broadcast %17 : vector<1x8x8xi1> to vector<2x8x8xi1>
    %19 = vector.broadcast %cst_4 : f32 to vector<2x8x8xf32>
    %20 = arith.select %18, %16, %19 : vector<2x8x8xi1>, vector<2x8x8xf32>
    %cst_5 = arith.constant dense<0xFF800000> : vector<2x8xf32>
    %21 = vector.multi_reduction <maximumf>, %20, %cst_5 [2] : vector<2x8x8xf32> to vector<2x8xf32>
    %22 = vector.shape_cast %21 : vector<2x8xf32> to vector<2x8x1xf32>
    %23 = vector.broadcast %22 : vector<2x8x1xf32> to vector<2x8x8xf32>
    %24 = arith.subf %20, %23 : vector<2x8x8xf32>
    %25 = math.exp %24 : vector<2x8x8xf32>
    %cst_6 = arith.constant dense<0.000000e+00> : vector<2x8xf32>
    %26 = vector.multi_reduction <add>, %25, %cst_6 [2] : vector<2x8x8xf32> to vector<2x8xf32>
    %27 = vector.shape_cast %26 : vector<2x8xf32> to vector<2x8x1xf32>
    %28 = tpu.reciprocal %27 : vector<2x8x1xf32> -> vector<2x8x1xf32>
    %29 = vector.broadcast %28 : vector<2x8x1xf32> to vector<2x8x8xf32>
    %30 = arith.mulf %25, %29 : vector<2x8x8xf32>
    "tpu.trace_start"() <{level = 10 : i32, message = "bts,bsd->btd"}> : () -> ()
    %cst_7 = arith.constant dense<0.000000e+00> : vector<2x8x16xf32>
    %31 = tpu.matmul %30, %15, %cst_7 {dimension_numbers = #tpu.dot_dimension_numbers<[2], [1], [1], [2], [0, 0, 0, 1, 1, 2], [0], [0]>} : vector<2x8x8xf32>, vector<2x8x16xf32>, vector<2x8x16xf32> -> vector<2x8x16xf32>
    "tpu.trace_stop"() : () -> ()
    %32 = vector.extract_strided_slice %4 {offsets = [0, 0, 16], sizes = [2, 8, 16], strides = [1, 1, 1]} : vector<2x8x128xf32> to vector<2x8x16xf32>
    %33 = vector.extract_strided_slice %6 {offsets = [0, 0, 16], sizes = [2, 8, 16], strides = [1, 1, 1]} : vector<2x8x128xf32> to vector<2x8x16xf32>
    %34 = vector.extract_strided_slice %8 {offsets = [0, 0, 16], sizes = [2, 8, 16], strides = [1, 1, 1]} : vector<2x8x128xf32> to vector<2x8x16xf32>
    "tpu.trace_start"() <{level = 10 : i32, message = "btd,bsd->bts"}> : () -> ()
    %cst_8 = arith.constant dense<0.000000e+00> : vector<2x8x8xf32>
    %35 = tpu.matmul %32, %33, %cst_8 {dimension_numbers = #tpu.dot_dimension_numbers<[2], [2], [1], [1], [0, 0, 0, 1, 1, 1], [0], [0]>} : vector<2x8x16xf32>, vector<2x8x16xf32>, vector<2x8x8xf32> -> vector<2x8x8xf32>
    %cst_9 = arith.constant 0xFF800000 : f32
    "tpu.trace_stop"() : () -> ()
    %36 = vector.shape_cast %12 : vector<1x8x8xi1> to vector<1x8x8xi1>
    %37 = vector.broadcast %36 : vector<1x8x8xi1> to vector<2x8x8xi1>
    %38 = vector.broadcast %cst_9 : f32 to vector<2x8x8xf32>
    %39 = arith.select %37, %35, %38 : vector<2x8x8xi1>, vector<2x8x8xf32>
    %cst_10 = arith.constant dense<0xFF800000> : vector<2x8xf32>
    %40 = vector.multi_reduction <maximumf>, %39, %cst_10 [2] : vector<2x8x8xf32> to vector<2x8xf32>
    %41 = vector.shape_cast %40 : vector<2x8xf32> to vector<2x8x1xf32>
    %42 = vector.broadcast %41 : vector<2x8x1xf32> to vector<2x8x8xf32>
    %43 = arith.subf %39, %42 : vector<2x8x8xf32>
    %44 = math.exp %43 : vector<2x8x8xf32>
    %cst_11 = arith.constant dense<0.000000e+00> : vector<2x8xf32>
    %45 = vector.multi_reduction <add>, %44, %cst_11 [2] : vector<2x8x8xf32> to vector<2x8xf32>
    %46 = vector.shape_cast %45 : vector<2x8xf32> to vector<2x8x1xf32>
    %47 = tpu.reciprocal %46 : vector<2x8x1xf32> -> vector<2x8x1xf32>
    %48 = vector.broadcast %47 : vector<2x8x1xf32> to vector<2x8x8xf32>
    %49 = arith.mulf %44, %48 : vector<2x8x8xf32>
    "tpu.trace_start"() <{level = 10 : i32, message = "bts,bsd->btd"}> : () -> ()
    %cst_12 = arith.constant dense<0.000000e+00> : vector<2x8x16xf32>
    %50 = tpu.matmul %49, %34, %cst_12 {dimension_numbers = #tpu.dot_dimension_numbers<[2], [1], [1], [2], [0, 0, 0, 1, 1, 2], [0], [0]>} : vector<2x8x8xf32>, vector<2x8x16xf32>, vector<2x8x16xf32> -> vector<2x8x16xf32>
    "tpu.trace_stop"() : () -> ()
    %51 = vector.extract_strided_slice %4 {offsets = [0, 0, 32], sizes = [2, 8, 16], strides = [1, 1, 1]} : vector<2x8x128xf32> to vector<2x8x16xf32>
    %52 = vector.extract_strided_slice %6 {offsets = [0, 0, 32], sizes = [2, 8, 16], strides = [1, 1, 1]} : vector<2x8x128xf32> to vector<2x8x16xf32>
    %53 = vector.extract_strided_slice %8 {offsets = [0, 0, 32], sizes = [2, 8, 16], strides = [1, 1, 1]} : vector<2x8x128xf32> to vector<2x8x16xf32>
    "tpu.trace_start"() <{level = 10 : i32, message = "btd,bsd->bts"}> : () -> ()
    %cst_13 = arith.constant dense<0.000000e+00> : vector<2x8x8xf32>
    %54 = tpu.matmul %51, %52, %cst_13 {dimension_numbers = #tpu.dot_dimension_numbers<[2], [2], [1], [1], [0, 0, 0, 1, 1, 1], [0], [0]>} : vector<2x8x16xf32>, vector<2x8x16xf32>, vector<2x8x8xf32> -> vector<2x8x8xf32>
    %cst_14 = arith.constant 0xFF800000 : f32
    "tpu.trace_stop"() : () -> ()
    %55 = vector.shape_cast %12 : vector<1x8x8xi1> to vector<1x8x8xi1>
    %56 = vector.broadcast %55 : vector<1x8x8xi1> to vector<2x8x8xi1>
    %57 = vector.broadcast %cst_14 : f32 to vector<2x8x8xf32>
    %58 = arith.select %56, %54, %57 : vector<2x8x8xi1>, vector<2x8x8xf32>
    %cst_15 = arith.constant dense<0xFF800000> : vector<2x8xf32>
    %59 = vector.multi_reduction <maximumf>, %58, %cst_15 [2] : vector<2x8x8xf32> to vector<2x8xf32>
    %60 = vector.shape_cast %59 : vector<2x8xf32> to vector<2x8x1xf32>
    %61 = vector.broadcast %60 : vector<2x8x1xf32> to vector<2x8x8xf32>
    %62 = arith.subf %58, %61 : vector<2x8x8xf32>
    %63 = math.exp %62 : vector<2x8x8xf32>
    %cst_16 = arith.constant dense<0.000000e+00> : vector<2x8xf32>
    %64 = vector.multi_reduction <add>, %63, %cst_16 [2] : vector<2x8x8xf32> to vector<2x8xf32>
    %65 = vector.shape_cast %64 : vector<2x8xf32> to vector<2x8x1xf32>
    %66 = tpu.reciprocal %65 : vector<2x8x1xf32> -> vector<2x8x1xf32>
    %67 = vector.broadcast %66 : vector<2x8x1xf32> to vector<2x8x8xf32>
    %68 = arith.mulf %63, %67 : vector<2x8x8xf32>
    "tpu.trace_start"() <{level = 10 : i32, message = "bts,bsd->btd"}> : () -> ()
    %cst_17 = arith.constant dense<0.000000e+00> : vector<2x8x16xf32>
    %69 = tpu.matmul %68, %53, %cst_17 {dimension_numbers = #tpu.dot_dimension_numbers<[2], [1], [1], [2], [0, 0, 0, 1, 1, 2], [0], [0]>} : vector<2x8x8xf32>, vector<2x8x16xf32>, vector<2x8x16xf32> -> vector<2x8x16xf32>
    "tpu.trace_stop"() : () -> ()
    %70 = vector.extract_strided_slice %4 {offsets = [0, 0, 48], sizes = [2, 8, 16], strides = [1, 1, 1]} : vector<2x8x128xf32> to vector<2x8x16xf32>
    %71 = vector.extract_strided_slice %6 {offsets = [0, 0, 48], sizes = [2, 8, 16], strides = [1, 1, 1]} : vector<2x8x128xf32> to vector<2x8x16xf32>
    %72 = vector.extract_strided_slice %8 {offsets = [0, 0, 48], sizes = [2, 8, 16], strides = [1, 1, 1]} : vector<2x8x128xf32> to vector<2x8x16xf32>
    "tpu.trace_start"() <{level = 10 : i32, message = "btd,bsd->bts"}> : () -> ()
    %cst_18 = arith.constant dense<0.000000e+00> : vector<2x8x8xf32>
    %73 = tpu.matmul %70, %71, %cst_18 {dimension_numbers = #tpu.dot_dimension_numbers<[2], [2], [1], [1], [0, 0, 0, 1, 1, 1], [0], [0]>} : vector<2x8x16xf32>, vector<2x8x16xf32>, vector<2x8x8xf32> -> vector<2x8x8xf32>
    %cst_19 = arith.constant 0xFF800000 : f32
    "tpu.trace_stop"() : () -> ()
    %74 = vector.shape_cast %12 : vector<1x8x8xi1> to vector<1x8x8xi1>
    %75 = vector.broadcast %74 : vector<1x8x8xi1> to vector<2x8x8xi1>
    %76 = vector.broadcast %cst_19 : f32 to vector<2x8x8xf32>
    %77 = arith.select %75, %73, %76 : vector<2x8x8xi1>, vector<2x8x8xf32>
    %cst_20 = arith.constant dense<0xFF800000> : vector<2x8xf32>
    %78 = vector.multi_reduction <maximumf>, %77, %cst_20 [2] : vector<2x8x8xf32> to vector<2x8xf32>
    %79 = vector.shape_cast %78 : vector<2x8xf32> to vector<2x8x1xf32>
    %80 = vector.broadcast %79 : vector<2x8x1xf32> to vector<2x8x8xf32>
    %81 = arith.subf %77, %80 : vector<2x8x8xf32>
    %82 = math.exp %81 : vector<2x8x8xf32>
    %cst_21 = arith.constant dense<0.000000e+00> : vector<2x8xf32>
    %83 = vector.multi_reduction <add>, %82, %cst_21 [2] : vector<2x8x8xf32> to vector<2x8xf32>
    %84 = vector.shape_cast %83 : vector<2x8xf32> to vector<2x8x1xf32>
    %85 = tpu.reciprocal %84 : vector<2x8x1xf32> -> vector<2x8x1xf32>
    %86 = vector.broadcast %85 : vector<2x8x1xf32> to vector<2x8x8xf32>
    %87 = arith.mulf %82, %86 : vector<2x8x8xf32>
    "tpu.trace_start"() <{level = 10 : i32, message = "bts,bsd->btd"}> : () -> ()
    %cst_22 = arith.constant dense<0.000000e+00> : vector<2x8x16xf32>
    %88 = tpu.matmul %87, %72, %cst_22 {dimension_numbers = #tpu.dot_dimension_numbers<[2], [1], [1], [2], [0, 0, 0, 1, 1, 2], [0], [0]>} : vector<2x8x8xf32>, vector<2x8x16xf32>, vector<2x8x16xf32> -> vector<2x8x16xf32>
    "tpu.trace_stop"() : () -> ()
    %89 = tpu.concatenate %31, %50, %69, %88 in 2 : vector<2x8x16xf32>, vector<2x8x16xf32>, vector<2x8x16xf32>, vector<2x8x16xf32> -> vector<2x8x64xf32>
    %90 = vector.shape_cast %89 : vector<2x8x64xf32> to vector<16x64xf32>
    %c0_23 = arith.constant 0 : index
    %c0_24 = arith.constant 0 : index
    %91 = vector.load %arg3[%c0_23, %c0_24] : memref<64x64xf32, #tpu.memory_space<vmem>>, vector<64x64xf32>
    %cst_25 = arith.constant dense<0.000000e+00> : vector<16x64xf32>
    %92 = tpu.matmul %90, %91, %cst_25 {dimension_numbers = #tpu.dot_dimension_numbers<[1], [0], [0], [1], [0, 0, 1, 1], [], []>} : vector<16x64xf32>, vector<64x64xf32>, vector<16x64xf32> -> vector<16x64xf32>
    %c0_26 = arith.constant 0 : index
    %c0_27 = arith.constant 0 : index
    %93 = vector.load %arg4[%c0_26, %c0_27] : memref<1x64xf32, #tpu.memory_space<vmem>>, vector<1x64xf32>
    %94 = vector.broadcast %93 : vector<1x64xf32> to vector<16x64xf32>
    %95 = arith.addf %92, %94 : vector<16x64xf32>
    %c0_28 = arith.constant 0 : index
    %c0_29 = arith.constant 0 : index
    %96 = vector.load %arg5[%c0_28, %c0_29] : memref<16x64xf32, #tpu.memory_space<vmem>>, vector<16x64xf32>
    tpu.vector_store %arg5[%c0_28, %c0_29], %95 {strides = array<i32>} : memref<16x64xf32, #tpu.memory_space<vmem>>, vector<16x64xf32>,
    return
  }
  func.func @transform_0(%arg0: i32) -> (i32, i32) {
    %c0_i32 = arith.constant 0 : i32
    %c0_i32_0 = arith.constant 0 : i32
    return %arg0, %c0_i32 : i32, i32
  }
  func.func @transform_1(%arg0: i32) -> (i32, i32) {
    %c0_i32 = arith.constant 0 : i32
    %c0_i32_0 = arith.constant 0 : i32
    %c0_i32_1 = arith.constant 0 : i32
    return %c0_i32, %c0_i32_0 : i32, i32
  }
  func.func @transform_2(%arg0: i32) -> (i32, i32) {
    %c0_i32 = arith.constant 0 : i32
    %c0_i32_0 = arith.constant 0 : i32
    %c0_i32_1 = arith.constant 0 : i32
    return %c0_i32, %c0_i32_0 : i32, i32
  }
  func.func @transform_3(%arg0: i32) -> (i32, i32) {
    %c0_i32 = arith.constant 0 : i32
    %c0_i32_0 = arith.constant 0 : i32
    %c0_i32_1 = arith.constant 0 : i32
    return %c0_i32, %c0_i32_0 : i32, i32
  }
  func.func @transform_4(%arg0: i32) -> (i32, i32) {
    %c0_i32 = arith.constant 0 : i32
    %c0_i32_0 = arith.constant 0 : i32
    return %arg0, %c0_i32 : i32, i32
  }
}

</mosaic_0001>

<bundles_post_ra>
// kernel: tpu_custom_call.1
= control target key start
LH: loop header
LB: loop body
LE: loop exit
PB: predicated region body
PF: predicated region fallthrough
CT: control target
= control target key end

     0   :  { %9 = vsyncpa [#allocation3], 0  ;;  %s2399_s0 = inlined_call_operand.hbm [shape: f32[16,64], index: 0, kind: input, shape index: {}]   ;;  %s2400_s1 = inlined_call_operand.hbm [shape: f32[64,384], index: 1, kind: input, shape index: {}]   ;;  %s2401_s2 = inlined_call_operand.hbm [shape: f32[64,64], index: 2, kind: input, shape index: {}]   ;;  %s2402_s3 = inlined_call_operand.vmem [shape: f32[1,64], index: 3, kind: input, shape index: {}]   ;;  %s2403_s4 = inlined_call_operand.hbm [shape: f32[16,64], index: 4, kind: output, shape index: {}]  }
   0x1   :  { %10 = vsyncpa [#allocation6], 0 }
   0x2   :  { %11 = vsyncpa [#allocation4], 0  ;;  %s2112_s15 = smov [#allocation5]   ;;  %s2018_s19 = scalar_lea.hbm %s2400_s1, 3072 }
   0x3   :  { %s29_s16 = sshll.u32 %s2112_s15, 4  ;;  %p2019_p0 = scmp.ne.s32.totalorder %s2400_s1, %s2018_s19  ;;  %s30_s16 = int_to_ptr.vmem [resolvable:$true] %s29_s16 }
   0x4   :  { %p2022_p1 = scmp.lt.u32.totalorder %s2018_s19, %s2400_s1 }
   0x6   :  { %p2024_p2 = pnand %p2022_p1, %p2019_p0 }
   0x8   :  { %2027 = shalt.err (!%p2024_p2)
}
   0x9   :  { %s2028_s24 = scalar_lea.vmem %s30_s16, 3072  ;;  %p2033_p4 = scmp.lt.s32.totalorder %s30_s16, %s30_s16 }
   0xa   :  { %p2029_p3 = scmp.ne.s32.totalorder %s30_s16, %s2028_s24  ;;  %p2034_p5 = scmp.lt.s32.totalorder %s2028_s24, %s2028_s24 }
   0xc   :  { %p2035_p6 = por %p2034_p5, %p2033_p4 }
   0xe   :  { %p2036_p7 = pnand %p2035_p6, %p2029_p3 }
  0x10   :  { %2039 = shalt.err (!%p2036_p7)
}
  0x11   :  { %s2113_s25 = smov 384   ;;  %s2114_s26 = smov 24  }
  0x12   :  { %35 = dma.hbm_to_vmem [thread:$0]  %s2400_s1, 3072, %s30_s16, [#allocation6], %s2113_s25, %s2113_s25, %s2114_s26  }
  0x13   :  { %s2115_s29 = smov [#allocation2]   ;;  %s2040_s7 = scalar_lea.hbm %s2399_s0, 256 }
  0x14   :  { %s17_s30 = sshll.u32 %s2115_s29, 4  ;;  %p2041_p8 = scmp.ne.s32.totalorder %s2399_s0, %s2040_s7  ;;  %s18_s30 = int_to_ptr.vmem [resolvable:$true] %s17_s30 }
  0x15   :  { %p2044_p9 = scmp.lt.u32.totalorder %s2040_s7, %s2399_s0 }
  0x17   :  { %p2046_p10 = pnand %p2044_p9, %p2041_p8 }
  0x19   :  { %2049 = shalt.err (!%p2046_p10)
}
  0x1a   :  { %s2050_s12 = scalar_lea.vmem %s18_s30, 256  ;;  %p2055_p12 = scmp.lt.s32.totalorder %s18_s30, %s18_s30 }
  0x1b   :  { %p2051_p11 = scmp.ne.s32.totalorder %s18_s30, %s2050_s12  ;;  %p2056_p13 = scmp.lt.s32.totalorder %s2050_s12, %s2050_s12 }
  0x1d   :  { %p2057_p0 = por %p2056_p13, %p2055_p12 }
  0x1f   :  { %p2058_p1 = pnand %p2057_p0, %p2051_p11 }
  0x21   :  { %2061 = shalt.err (!%p2058_p1)
}
  0x22   :  { %s2116_s1 = smov 128   ;;  %s2117_s13 = smov 8  }
  0x23   :  { %23 = dma.hbm_to_vmem [thread:$0]  %s2399_s0, 256, %s18_s30, [#allocation3], %s2116_s1, %s2116_s1, %s2117_s13  }
  0x24   :  { %s2118_s16 = smov [#allocation7]   ;;  %s2062_s20 = scalar_lea.hbm %s2401_s2, 1024 }
  0x25   :  { %s41_s17 = sshll.u32 %s2118_s16, 4  ;;  %p2063_p2 = scmp.ne.s32.totalorder %s2401_s2, %s2062_s20  ;;  %s42_s17 = int_to_ptr.vmem [resolvable:$true] %s41_s17 }
  0x26   :  { %p2066_p3 = scmp.lt.u32.totalorder %s2062_s20, %s2401_s2 }
  0x28   :  { %p2068_p4 = pnand %p2066_p3, %p2063_p2 }
  0x2a   :  { %2071 = shalt.err (!%p2068_p4)
}
  0x2b   :  { %s2072_s25 = scalar_lea.vmem %s42_s17, 1024  ;;  %p2077_p6 = scmp.lt.s32.totalorder %s42_s17, %s42_s17 }
  0x2c   :  { %p2073_p5 = scmp.ne.s32.totalorder %s42_s17, %s2072_s25  ;;  %p2078_p7 = scmp.lt.s32.totalorder %s2072_s25, %s2072_s25 }
  0x2e   :  { %p2079_p8 = por %p2078_p7, %p2077_p6 }
  0x30   :  { %p2080_p9 = pnand %p2079_p8, %p2073_p5 }
  0x32   :  { %2083 = shalt.err (!%p2080_p9)
}
  0x33   :  { %47 = dma.hbm_to_vmem [thread:$0]  %s2401_s2, 1024, %s42_s17, [#allocation6], %s2116_s1, %s2116_s1, %s2117_s13  }
  0x34   :  { %2106 = dma.done.wait [#allocation3], 256  }
  0x35   :  { %2107 = vsyncadd [#allocation3], 4294967040 }
  0x36   :  { %2108 = dma.done.wait [#allocation6], 4096  }
  0x37   :  { %2109 = vsyncadd [#allocation6], 4294963200  ;;  %v2119_v0 = vmov 0.0   ;;  %v62_v1 = vld [vmem:[#allocation5 + $0x8] sm:$0xff]  ;;  %v65_v2 = vld [vmem:[#allocation5 + $0x20] sm:$0xff]  ;;  %vm85_vm0 = vcmask 523264   ;;  %v244_v43 = vlaneseq }
  0x38   :  { %156 = vmatprep.mubr.f32.mxu0 %v2119_v0  ;;  %v61_v3 = vld [vmem:[#allocation5] sm:$0xff]  ;;  %v1922_v4 = vpack.c.bf16 %v65_v2, %v62_v1  ;;  %v64_v5 = vld [vmem:[#allocation5 + $0x18] sm:$0xff]  ;;  %v71_v7 = vld [vmem:[#allocation5 + $0x50] sm:$0xff]  ;;  %vm2120_vm1 = vmmov 0   ;;  %vm249_vm2 = vcmask 130048   ;;  %s2121_s2 = smov 112  }
  0x39   :  { %v68_v6 = vld [vmem:[#allocation5 + $0x38] sm:$0xff]  ;;  %v1924_v8 = vpack.c.bf16 %v64_v5, %v61_v3  ;;  %v67_v10 = vld [vmem:[#allocation5 + $0x30] sm:$0xff]  ;;  %v70_v11 = vld [vmem:[#allocation5 + $0x48] sm:$0xff]  ;;  %v245_v44 = vshrl.u32 %v244_v43, 7  ;;  %v247_v45 = vand.u32 127, %v244_v43  ;;  %vm406_vm4 = vcmask 64512  }
  0x3a   :  { %v1926_v9 = vpack.c.bf16 %v71_v7, %v68_v6  ;;  %v74_v12 = vld [vmem:[#allocation5 + $0x68] sm:$0xff]  ;;  %1923 = vmatprep.subr.bf16.mxu0 %v1922_v4  ;;  %v77_v13 = vld [vmem:[#allocation5 + $0x80] sm:$0xff]  ;;  %v1928_v14 = vpack.c.bf16 %v70_v11, %v67_v10  ;;  %v76_v17 = vld [vmem:[#allocation5 + $0x78] sm:$0xff]  ;;  %s2122_s27 = smov 96   ;;  %s2123_s28 = smov 80   ;;  %vm1602_vm5 = vcmask 392192  }
  0x3b   :  { %1925 = vmatpush1.bf16.msra.mxu0 %v1924_v8  ;;  %v1930_v15 = vpack.c.bf16 %v77_v13, %v74_v12  ;;  %v73_v16 = vld [vmem:[#allocation5 + $0x60] sm:$0xff]  ;;  %v59_v18 = vld [vmem:[#allocation2] sm:$0xff]  ;;  %v80_v19 = vld [vmem:[#allocation5 + $0x98] sm:$0xff]  ;;  %vm2233_vm3 = vcmp.ge.s32.totalorder %v245_v44, %v247_v45  ;;  %s2124_s29 = smov 16   ;;  %s2125_s30 = smov 32   ;;  %vm1599_vm6 = vcmask 261120  }
  0x3c   :  { %1927 = vmatprep.subr.bf16.mxu0 %v1926_v9  ;;  %v83_v20 = vld [vmem:[#allocation5 + $0xb0] sm:$0xff]  ;;  %1820 = vmatprep.mubr.msk.f32.mxu1 %vm85_vm0, %v59_v18  ;;  %v1932_v21 = vpack.c.bf16 %v76_v17, %v73_v16  ;;  %v82_v24 = vld [vmem:[#allocation5 + $0xa8] sm:$0xff]  ;;  %v60_v26 = vld [vmem:[#allocation2 + $0x8] sm:$0xff]  ;;  %s2126_s5 = smov 48   ;;  %s2127_s8 = smov [#allocation8]  }
  0x3d   :  { %v1934_v22 = vpack.c.bf16 %v83_v20, %v80_v19  ;;  %v79_v23 = vld [vmem:[#allocation5 + $0x90] sm:$0xff]  ;;  %v66_v32 = vld [vmem:[#allocation5 + $0x28] sm:$0xff]  ;;  %v69_v33 = vld [vmem:[#allocation5 + $0x40] sm:$0xff]  ;;  %s1708_s9 = sshll.u32 %s2127_s8, 4  ;;  %s1709_s9 = int_to_ptr.vmem [resolvable:$true] %s1708_s9 }
  0x3e   :  { %v1936_v25 = vpack.c.bf16 %v82_v24, %v79_v23  ;;  %v63_v31 = vld [vmem:[#allocation5 + $0x10] sm:$0xff]  ;;  %v72_v35 = vld [vmem:[#allocation5 + $0x58] sm:$0xff]  ;;  %v78_v38 = vld [vmem:[#allocation5 + $0x88] sm:$0xff]  ;;  %s2084_s10 = scalar_lea.vmem %s1709_s9, 256  ;;  %p2089_p11 = scmp.lt.s32.totalorder %s1709_s9, %s1709_s9 }
  0x3f   :  { %1929 = vmatpush1.bf16.msra.mxu0 %v1928_v14  ;;  %v1938_v34 = vpack.c.bf16 %v66_v32, %v63_v31  ;;  %v1942_v36 = vpack.c.bf16 %v72_v35, %v69_v33  ;;  %v75_v37 = vld [vmem:[#allocation5 + $0x70] sm:$0xff]  ;;  %v81_v40 = vld [vmem:[#allocation5 + $0xa0] sm:$0xff]  ;;  %v84_v41 = vld [vmem:[#allocation5 + $0xb8] sm:$0xff]  ;;  %p2085_p10 = scmp.ne.s32.totalorder %s1709_s9, %s2084_s10  ;;  %p2090_p12 = scmp.lt.s32.totalorder %s2084_s10, %s2084_s10 }
  0x40   :  { %1931 = vmatprep.subr.bf16.mxu0 %v1930_v15  ;;  %v1946_v39 = vpack.c.bf16 %v78_v38, %v75_v37  ;;  %v1950_v42 = vpack.c.bf16 %v84_v41, %v81_v40 }
  0x41   :  { %1939 = vmatprep.subr.bf16.mxu1 %v1938_v34  ;;  %p2091_p13 = por %p2090_p12, %p2089_p11 }
  0x42   :  { %1941 = vmatpush3.bf16.msra.mxu1 %v1938_v34 }
  0x43   :  { %1933 = vmatpush1.bf16.msra.mxu0 %v1932_v21  ;;  %1943 = vmatprep.subr.bf16.mxu1 %v1942_v36  ;;  %p2092_p0 = pnand %p2091_p13, %p2085_p10 }
  0x44   :  { %1935 = vmatprep.subr.bf16.mxu0 %v1934_v22 }
  0x46   :  { %1945 = vmatpush3.bf16.msra.mxu1 %v1942_v36 }
  0x47   :  { %1937 = vmatpush1.bf16.msra.mxu0 %v1936_v25  ;;  %1947 = vmatprep.subr.bf16.mxu1 %v1946_v39 }
  0x48   :  { %1823 = vmatprep.subr.mxu0 %v2119_v0 }
  0x4a   :  { %1721 = vmatmul.mubr.msk.f32.vlgmr.msra.gmra.mrb[0].mxu0 %vm85_vm0, %v59_v18  ;;  %1949 = vmatpush3.bf16.msra.mxu1 %v1946_v39 }
  0x4b   :  { %162 = vmatprep.mubr.f32.mxu0 %v2119_v0  ;;  %1951 = vmatprep.subr.bf16.mxu1 %v1950_v42 }
  0x4e   :  { %1722 = vmatmul.mubr.msk.f32.gmra.mrb[2].mxu0 %vm85_vm0, %v60_v26  ;;  %1953 = vmatpush3.bf16.msra.mxu1 %v1950_v42 }
  0x4f   :  { %1825 = vmatprep.mubr.msk.f32.mxu0 %vm2120_vm1, %v2119_v0  ;;  %1833 = vmatprep.subr.mxu1 %v2119_v0 }
  0x51   :  { %1821 = vmatmul.mubr.msk.f32.vlgmr.msra.gmra.mrb[0].mxu1 %vm85_vm0, %v60_v26 }
  0x52   :  { %1835 = vmatprep.mubr.msk.f32.mxu1 %vm2120_vm1, %v2119_v0 }
 0x11d   :  { %v2203_v27 = vpop.f32.mrb[0].mxu0 }
 0x11e   :  { %v2205_v28 = vpop.f32.mrb[1].mxu0 }
 0x11f   :  { %1824 = vmatpush3.xpose.msk.msra.mxu0 %vm249_vm2, %v2205_v28 }
 0x120   :  { %1828 = vmatprep.subr.mxu0 %v2119_v0 }
 0x121   :  { %v2210_v29 = vpop.f32.mrb[2].mxu0 }
 0x122   :  { %v2212_v30 = vpop.f32.mrb[3].mxu0  ;;  %1826 = vmatmul.mubr.msk.f32.vlgmr.msra.gmra.mrb[4].mxu0 %vm249_vm2, %v2203_v27 }
 0x123   :  { %655 = vrot.lane.b32.xlu1 %v2212_v30, %s2121_s2  ;;  %1829 = vmatpush3.xpose.msk.msra.mxu0 %vm249_vm2, %v2212_v30 }
 0x124   :  { %1830 = vmatprep.mubr.msk.f32.mxu0 %vm2120_vm1, %v2119_v0  ;;  %1838 = vmatprep.subr.mxu0 %v2119_v0  ;;  %v2247_v2 = vpop.f32.mrb[0].mxu1 }
 0x125   :  { %v2249_v3 = vpop.f32.mrb[1].mxu1 }
 0x126   :  { %1831 = vmatmul.mubr.msk.f32.vlgmr.msra.gmra.mrb[6].mxu0 %vm249_vm2, %v2210_v29  ;;  %1834 = vmatpush3.msra.mxu1 %v2249_v3 }
 0x127   :  { %575 = vrot.lane.b32.xlu1 %v2203_v27, %s2121_s2  ;;  %1840 = vmatprep.mubr.msk.f32.mxu0 %vm2120_vm1, %v2119_v0 }
 0x128   :  { %1839 = vmatpush3.msra.mxu0 %v2247_v2  ;;  %1843 = vmatprep.subr.mxu1 %v2119_v0 }
 0x129   :  { %1848 = vmatprep.subr.mxu0 %v2119_v0 }
 0x195   :  { %v656_v4 = vpop.permute.xlu1 %655 }
 0x199   :  { %v576_v5 = vpop.permute.xlu1 %575 }
 0x1f5   :  { %v322_v47 = vpop.f32.mrb[4].mxu0 }
 0x1f6   :  { %v404_v48 = vsel %vm2233_vm3, %v322_v47, -inf  ;;  %v1827_v49 = vpop.f32.mrb[5].mxu0 }
 0x1f7   :  { %v407_v50 = vsel %vm406_vm4, %v404_v48, -inf }
 0x1f8   :  { %408 = vmax.xlane.f32.xlu0 %v407_v50 }
 0x1f9   :  { %v398_v51 = vpop.f32.mrb[6].mxu0 }
 0x1fa   :  { %v405_v52 = vsel %vm2233_vm3, %v398_v51, -inf  ;;  %v1832_v53 = vpop.f32.mrb[7].mxu0 }
 0x1fb   :  { %v410_v54 = vsel %vm406_vm4, %v405_v52, -inf }
 0x1fc   :  { %411 = vmax.xlane.f32.xlu0 %v410_v54 }
 0x212   :  { %577 = vrot.lane.b32.xlu0 %v2205_v28, %s2121_s2 }
 0x285   :  { %v409_v55 = vpop.xlane.xlu0 %408 }
 0x286   :  { %v413_v56 = vsub.f32 %v404_v48, %v409_v55 }
 0x288   :  { %v415_v57 = vmul.f32 1.442695, %v413_v56 }
 0x289   :  { %v412_v58 = vpop.xlane.xlu0 %411 }
 0x28a   :  { %1986 = vpow2.f32 %v415_v57  ;;  %v414_v59 = vsub.f32 %v405_v52, %v412_v58 }
 0x28c   :  { %v417_v60 = vmul.f32 1.442695, %v414_v59 }
 0x28d   :  { %v578_v10 = vpop.permute.xlu0 %577 }
 0x28e   :  { %1988 = vpow2.f32 %v417_v60 }
 0x294   :  { %v1987_v61 = vpop.eup %1986 }
 0x295   :  { %v419_v62 = vsel %vm406_vm4, %v1987_v61, 0.0 }
 0x296   :  { %420 = vadd.xlane.f32.xlu1 %v419_v62 }
 0x298   :  { %v1989_v63 = vpop.eup %1988 }
 0x299   :  { %v422_v1 = vsel %vm406_vm4, %v1989_v63, 0.0 }
 0x29a   :  { %423 = vadd.xlane.f32.xlu1 %v422_v1 }
 0x2ab   :  { %653 = vrot.lane.b32.xlu1 %v2210_v29, %s2121_s2 }
 0x323   :  { %v421_v6 = vpop.xlane.xlu1 %420 }
 0x324   :  { %1990 = vrcp.f32 %v421_v6 }
 0x327   :  { %v424_v7 = vpop.xlane.xlu1 %423 }
 0x328   :  { %1992 = vrcp.f32 %v424_v7 }
 0x32b   :  { %v654_v13 = vpop.permute.xlu1 %653 }
 0x32e   :  { %v1991_v8 = vpop.eup %1990 }
 0x32f   :  { %v427_v9 = vmul.f32 %v1991_v8, %v1987_v61 }
 0x331   :  { %1836 = vmatmul.mubr.msk.f32.vlgmr.msra.gmra.mrb[2].mxu1 %vm406_vm4, %v427_v9 }
 0x332   :  { %v1993_v11 = vpop.eup %1992  ;;  %1844 = vmatpush3.xpose.msk.msra.mxu1 %vm249_vm2, %v578_v10  ;;  %1845 = vmatprep.mubr.msk.f32.mxu1 %vm2120_vm1, %v2119_v0 }
 0x333   :  { %v428_v12 = vmul.f32 %v1993_v11, %v1989_v63  ;;  %1853 = vmatprep.subr.mxu1 %v2119_v0 }
 0x335   :  { %1841 = vmatmul.mubr.msk.f32.vlgmr.msra.gmra.mrb[8].mxu0 %vm406_vm4, %v428_v12  ;;  %1846 = vmatmul.mubr.msk.f32.vlgmr.msra.gmra.mrb[4].mxu1 %vm249_vm2, %v576_v5 }
 0x336   :  { %1849 = vmatpush3.xpose.msk.msra.mxu0 %vm249_vm2, %v656_v4  ;;  %1850 = vmatprep.mubr.msk.f32.mxu0 %vm2120_vm1, %v2119_v0 }
 0x337   :  { %1858 = vmatprep.subr.mxu0 %v2119_v0  ;;  %1855 = vmatprep.mubr.msk.f32.mxu1 %vm2120_vm1, %v2119_v0 }
 0x339   :  { %1851 = vmatmul.mubr.msk.f32.vlgmr.msra.gmra.mrb[10].mxu0 %vm249_vm2, %v654_v13 }
 0x33a   :  { %1860 = vmatprep.mubr.msk.f32.mxu0 %vm2120_vm1, %v2119_v0 }
 0x404   :  { %v2273_v14 = vpop.f32.mrb[2].mxu1 }
 0x405   :  { %v1837_v15 = vpop.f32.mrb[3].mxu1 }
 0x408   :  { %v2275_v16 = vpop.f32.mrb[8].mxu0  ;;  %v649_v17 = vpop.f32.mrb[4].mxu1 }
 0x409   :  { %v731_v18 = vsel %vm2233_vm3, %v649_v17, -inf  ;;  %v1842_v19 = vpop.f32.mrb[9].mxu0  ;;  %v1847_v20 = vpop.f32.mrb[5].mxu1 }
 0x40a   :  { %v733_v21 = vsel %vm406_vm4, %v731_v18, -inf }
 0x40b   :  { %734 = vmax.xlane.f32.xlu0 %v733_v21 }
 0x40c   :  { %v727_v22 = vpop.f32.mrb[10].mxu0 }
 0x40d   :  { %v732_v23 = vsel %vm2233_vm3, %v727_v22, -inf  ;;  %v1852_v24 = vpop.f32.mrb[11].mxu0 }
 0x40e   :  { %v736_v25 = vsel %vm406_vm4, %v732_v23, -inf }
 0x40f   :  { %737 = vmax.xlane.f32.xlu1 %v736_v25 }
 0x420   :  { %833 = vrot.lane.b32.xlu1 %v2247_v2, %s2121_s2 }
 0x421   :  { %756 = vrot.lane.b32.xlu0 %v2249_v3, %s2121_s2 }
 0x424   :  { %911 = vrot.lane.b32.xlu1 %v2205_v28, %s2122_s27 }
 0x428   :  { %989 = vrot.lane.b32.xlu1 %v2212_v30, %s2122_s27 }
 0x42c   :  { %987 = vrot.lane.b32.xlu1 %v2210_v29, %s2122_s27 }
 0x498   :  { %v735_v26 = vpop.xlane.xlu0 %734 }
 0x499   :  { %v739_v31 = vsub.f32 %v731_v18, %v735_v26 }
 0x49b   :  { %v741_v32 = vmul.f32 1.442695, %v739_v31 }
 0x49c   :  { %v757_v33 = vpop.permute.xlu0 %756  ;;  %v738_v34 = vpop.xlane.xlu1 %737 }
 0x49d   :  { %1994 = vpow2.f32 %v741_v32  ;;  %v740_v35 = vsub.f32 %v732_v23, %v738_v34  ;;  %1854 = vmatpush3.msra.mxu1 %v757_v33 }
 0x49e   :  { %1863 = vmatprep.subr.mxu1 %v2119_v0 }
 0x49f   :  { %v743_v36 = vmul.f32 1.442695, %v740_v35 }
 0x4a0   :  { %v834_v37 = vpop.permute.xlu1 %833 }
 0x4a1   :  { %1996 = vpow2.f32 %v743_v36  ;;  %1859 = vmatpush3.msra.mxu0 %v834_v37 }
 0x4a2   :  { %1868 = vmatprep.subr.mxu0 %v2119_v0 }
 0x4a4   :  { %v912_v44 = vpop.permute.xlu1 %911 }
 0x4a7   :  { %v1995_v38 = vpop.eup %1994 }
 0x4a8   :  { %v745_v39 = vsel %vm406_vm4, %v1995_v38, 0.0  ;;  %v990_v49 = vpop.permute.xlu1 %989 }
 0x4a9   :  { %746 = vadd.xlane.f32.xlu0 %v745_v39 }
 0x4ab   :  { %v1997_v40 = vpop.eup %1996 }
 0x4ac   :  { %v748_v41 = vsel %vm406_vm4, %v1997_v40, 0.0  ;;  %v988_v52 = vpop.permute.xlu1 %987 }
 0x4ad   :  { %749 = vadd.xlane.f32.xlu0 %v748_v41 }
 0x4c3   :  { %909 = vrot.lane.b32.xlu0 %v2203_v27, %s2122_s27 }
 0x536   :  { %v747_v42 = vpop.xlane.xlu0 %746 }
 0x537   :  { %1998 = vrcp.f32 %v747_v42 }
 0x53a   :  { %v750_v43 = vpop.xlane.xlu0 %749 }
 0x53b   :  { %2000 = vrcp.f32 %v750_v43 }
 0x53e   :  { %v910_v51 = vpop.permute.xlu0 %909 }
 0x541   :  { %v1999_v45 = vpop.eup %1998 }
 0x542   :  { %v753_v47 = vmul.f32 %v1999_v45, %v1995_v38 }
 0x544   :  { %1856 = vmatmul.mubr.msk.f32.vlgmr.msra.gmra.mrb[6].mxu1 %vm406_vm4, %v753_v47 }
 0x545   :  { %v2001_v48 = vpop.eup %2000  ;;  %1864 = vmatpush3.xpose.msk.msra.mxu1 %vm249_vm2, %v912_v44  ;;  %1865 = vmatprep.mubr.msk.f32.mxu1 %vm2120_vm1, %v2119_v0 }
 0x546   :  { %v754_v50 = vmul.f32 %v2001_v48, %v1997_v40  ;;  %1873 = vmatprep.subr.mxu1 %v2119_v0 }
 0x548   :  { %1861 = vmatmul.mubr.msk.f32.vlgmr.msra.gmra.mrb[12].mxu0 %vm406_vm4, %v754_v50  ;;  %1866 = vmatmul.mubr.msk.f32.vlgmr.msra.gmra.mrb[8].mxu1 %vm249_vm2, %v910_v51 }
 0x549   :  { %1869 = vmatpush3.xpose.msk.msra.mxu0 %vm249_vm2, %v990_v49  ;;  %1870 = vmatprep.mubr.msk.f32.mxu0 %vm2120_vm1, %v2119_v0 }
 0x54a   :  { %1878 = vmatprep.subr.mxu0 %v2119_v0  ;;  %1875 = vmatprep.mubr.msk.f32.mxu1 %vm2120_vm1, %v2119_v0 }
 0x54c   :  { %1871 = vmatmul.mubr.msk.f32.vlgmr.msra.gmra.mrb[14].mxu0 %vm249_vm2, %v988_v52 }
 0x54d   :  { %1880 = vmatprep.mubr.msk.f32.mxu0 %vm2120_vm1, %v2119_v0 }
 0x617   :  { %v2315_v53 = vpop.f32.mrb[6].mxu1 }
 0x618   :  { %v1857_v54 = vpop.f32.mrb[7].mxu1 }
 0x61b   :  { %v2317_v55 = vpop.f32.mrb[12].mxu0  ;;  %v983_v56 = vpop.f32.mrb[8].mxu1 }
 0x61c   :  { %v1065_v57 = vsel %vm2233_vm3, %v983_v56, -inf  ;;  %v1862_v58 = vpop.f32.mrb[13].mxu0  ;;  %v1867_v59 = vpop.f32.mrb[9].mxu1  ;;  %v1605_v56 = vld [vmem:[#allocation7] sm:$0xff] }
 0x61d   :  { %v1067_v60 = vsel %vm406_vm4, %v1065_v57, -inf  ;;  %v1607_v58 = vld [vmem:[#allocation7 + $0x10] sm:$0xff] }
 0x61e   :  { %1068 = vmax.xlane.f32.xlu0 %v1067_v60 }
 0x61f   :  { %v1061_v61 = vpop.f32.mrb[14].mxu0 }
 0x620   :  { %v1066_v62 = vsel %vm2233_vm3, %v1061_v61, -inf  ;;  %v1872_v63 = vpop.f32.mrb[15].mxu0  ;;  %v1609_v61 = vld [vmem:[#allocation7 + $0x20] sm:$0xff] }
 0x621   :  { %v1070_v1 = vsel %vm406_vm4, %v1066_v62, -inf }
 0x622   :  { %1071 = vmax.xlane.f32.xlu1 %v1070_v1  ;;  %v1611_v1 = vld [vmem:[#allocation7 + $0x30] sm:$0xff] }
 0x633   :  { %1165 = vrot.lane.b32.xlu1 %v2247_v2, %s2122_s27 }
 0x634   :  { %1089 = vrot.lane.b32.xlu0 %v2249_v3, %s2122_s27 }
 0x637   :  { %1243 = vrot.lane.b32.xlu1 %v2205_v28, %s2123_s28 }
 0x63b   :  { %1321 = vrot.lane.b32.xlu1 %v2212_v30, %s2123_s28 }
 0x63f   :  { %1319 = vrot.lane.b32.xlu1 %v2210_v29, %s2123_s28 }
 0x6ab   :  { %v1069_v4 = vpop.xlane.xlu0 %1068 }
 0x6ac   :  { %v1073_v5 = vsub.f32 %v1065_v57, %v1069_v4  ;;  %v1606_v57 = vld [vmem:[#allocation7 + $0x8] sm:$0xff]  ;;  %v1612_v4 = vld [vmem:[#allocation7 + $0x38] sm:$0xff] }
 0x6ad   :  { %v1954_v59 = vpack.c.bf16 %v1606_v57, %v1605_v56 }
 0x6ae   :  { %v1075_v6 = vmul.f32 1.442695, %v1073_v5  ;;  %v1966_v5 = vpack.c.bf16 %v1612_v4, %v1611_v1 }
 0x6af   :  { %v1090_v7 = vpop.permute.xlu0 %1089  ;;  %v1072_v8 = vpop.xlane.xlu1 %1071 }
 0x6b0   :  { %2002 = vpow2.f32 %v1075_v6  ;;  %v1074_v9 = vsub.f32 %v1066_v62, %v1072_v8  ;;  %1874 = vmatpush3.msra.mxu1 %v1090_v7  ;;  %v1610_v62 = vld [vmem:[#allocation7 + $0x28] sm:$0xff] }
 0x6b1   :  { %1883 = vmatprep.subr.mxu1 %v2119_v0  ;;  %v1962_v63 = vpack.c.bf16 %v1610_v62, %v1609_v61 }
 0x6b2   :  { %v1077_v10 = vmul.f32 1.442695, %v1074_v9 }
 0x6b3   :  { %v1166_v11 = vpop.permute.xlu1 %1165 }
 0x6b4   :  { %2004 = vpow2.f32 %v1077_v10  ;;  %1879 = vmatpush3.msra.mxu0 %v1166_v11 }
 0x6b5   :  { %1888 = vmatprep.subr.mxu0 %v2119_v0 }
 0x6b7   :  { %v1244_v17 = vpop.permute.xlu1 %1243 }
 0x6ba   :  { %v2003_v28 = vpop.eup %2002 }
 0x6bb   :  { %v1079_v30 = vsel %vm406_vm4, %v2003_v28, 0.0  ;;  %v1322_v21 = vpop.permute.xlu1 %1321 }
 0x6bc   :  { %1080 = vadd.xlane.f32.xlu0 %v1079_v30 }
 0x6be   :  { %v2005_v29 = vpop.eup %2004 }
 0x6bf   :  { %v1082_v12 = vsel %vm406_vm4, %v2005_v29, 0.0  ;;  %v1320_v23 = vpop.permute.xlu1 %1319 }
 0x6c0   :  { %1083 = vadd.xlane.f32.xlu0 %v1082_v12 }
 0x6d6   :  { %1241 = vrot.lane.b32.xlu0 %v2203_v27, %s2123_s28 }
 0x749   :  { %v1081_v13 = vpop.xlane.xlu0 %1080 }
 0x74a   :  { %2006 = vrcp.f32 %v1081_v13 }
 0x74d   :  { %v1084_v15 = vpop.xlane.xlu0 %1083 }
 0x74e   :  { %2008 = vrcp.f32 %v1084_v15 }
 0x751   :  { %v1242_v27 = vpop.permute.xlu0 %1241 }
 0x754   :  { %v2007_v18 = vpop.eup %2006 }
 0x755   :  { %v1087_v19 = vmul.f32 %v2007_v18, %v2003_v28 }
 0x757   :  { %1876 = vmatmul.mubr.msk.f32.vlgmr.msra.gmra.mrb[10].mxu1 %vm406_vm4, %v1087_v19 }
 0x758   :  { %v2009_v20 = vpop.eup %2008  ;;  %1884 = vmatpush3.xpose.msk.msra.mxu1 %vm249_vm2, %v1244_v17  ;;  %1885 = vmatprep.mubr.msk.f32.mxu1 %vm2120_vm1, %v2119_v0 }
 0x759   :  { %v1088_v22 = vmul.f32 %v2009_v20, %v2005_v29  ;;  %1893 = vmatprep.subr.mxu1 %v2119_v0 }
 0x75b   :  { %1881 = vmatmul.mubr.msk.f32.vlgmr.msra.gmra.mrb[16].mxu0 %vm406_vm4, %v1088_v22  ;;  %1886 = vmatmul.mubr.msk.f32.vlgmr.msra.gmra.mrb[12].mxu1 %vm249_vm2, %v1242_v27 }
 0x75c   :  { %1889 = vmatpush3.xpose.msk.msra.mxu0 %vm249_vm2, %v1322_v21  ;;  %1890 = vmatprep.mubr.msk.f32.mxu0 %vm2120_vm1, %v2119_v0  ;;  %v1749_v21 = vld [vmem:[%s2402_s3] ss:$0 sm:$0xff] }
 0x75d   :  { %1898 = vmatprep.subr.mxu0 %v2119_v0  ;;  %1895 = vmatprep.mubr.msk.f32.mxu1 %vm2120_vm1, %v2119_v0 }
 0x75f   :  { %1891 = vmatmul.mubr.msk.f32.vlgmr.msra.gmra.mrb[18].mxu0 %vm249_vm2, %v1320_v23 }
 0x760   :  { %1900 = vmatprep.mubr.msk.f32.mxu0 %vm2120_vm1, %v2119_v0 }
 0x82a   :  { %v1161_v24 = vpop.f32.mrb[10].mxu1 }
 0x82b   :  { %v1877_v25 = vpop.f32.mrb[11].mxu1 }
 0x82e   :  { %v1237_v26 = vpop.f32.mrb[16].mxu0  ;;  %v1315_v31 = vpop.f32.mrb[12].mxu1 }
 0x82f   :  { %v1397_v32 = vsel %vm2233_vm3, %v1315_v31, -inf  ;;  %v1882_v33 = vpop.f32.mrb[17].mxu0  ;;  %v1887_v34 = vpop.f32.mrb[13].mxu1 }
 0x830   :  { %v1399_v35 = vsel %vm406_vm4, %v1397_v32, -inf }
 0x831   :  { %1400 = vmax.xlane.f32.xlu0 %v1399_v35 }
 0x832   :  { %v1393_v36 = vpop.f32.mrb[18].mxu0 }
 0x833   :  { %v1398_v37 = vsel %vm2233_vm3, %v1393_v36, -inf  ;;  %v1892_v38 = vpop.f32.mrb[19].mxu0 }
 0x834   :  { %v1402_v39 = vsel %vm406_vm4, %v1398_v37, -inf }
 0x835   :  { %1403 = vmax.xlane.f32.xlu1 %v1402_v39 }
 0x846   :  { %1497 = vrot.lane.b32.xlu1 %v2247_v2, %s2123_s28 }
 0x84a   :  { %1575 = vrot.lane.b32.xlu1 %v2315_v53, %s2124_s29 }
 0x84e   :  { %1577 = vrot.lane.b32.xlu1 %v2317_v55, %s2124_s29 }
 0x852   :  { %1585 = vrot.lane.b32.xlu1 %v1237_v26, %s2125_s30 }
 0x8be   :  { %v1401_v0 = vpop.xlane.xlu0 %1400 }
 0x8bf   :  { %v1405_v40 = vsub.f32 %v1397_v32, %v1401_v0 }
 0x8c1   :  { %v1407_v41 = vmul.f32 1.442695, %v1405_v40 }
 0x8c2   :  { %v1404_v42 = vpop.xlane.xlu1 %1403 }
 0x8c3   :  { %2010 = vpow2.f32 %v1407_v41  ;;  %v1406_v46 = vsub.f32 %v1398_v37, %v1404_v42 }
 0x8c5   :  { %v1409_v43 = vmul.f32 1.442695, %v1406_v46 }
 0x8c6   :  { %v1498_v44 = vpop.permute.xlu1 %1497 }
 0x8c7   :  { %2012 = vpow2.f32 %v1409_v43  ;;  %1899 = vmatpush3.msra.mxu0 %v1498_v44 }
 0x8ca   :  { %v1576_v10 = vpop.permute.xlu1 %1575 }
 0x8cb   :  { %v1597_v30 = vsel %vm249_vm2, %v2273_v14, %v1576_v10 }
 0x8cd   :  { %v2011_v45 = vpop.eup %2010 }
 0x8ce   :  { %v1411_v2 = vsel %vm406_vm4, %v2011_v45, 0.0  ;;  %v1578_v11 = vpop.permute.xlu1 %1577 }
 0x8cf   :  { %1412 = vadd.xlane.f32.xlu0 %v1411_v2  ;;  %v1598_v17 = vsel %vm249_vm2, %v2275_v16, %v1578_v11 }
 0x8d1   :  { %v2013_v47 = vpop.eup %2012 }
 0x8d2   :  { %v1414_v48 = vsel %vm406_vm4, %v2013_v47, 0.0  ;;  %v1586_v29 = vpop.permute.xlu1 %1585 }
 0x8d3   :  { %1415 = vadd.xlane.f32.xlu0 %v1414_v48  ;;  %v1601_v18 = vsel %vm1599_vm6, %v1598_v17, %v1586_v29 }
 0x8e9   :  { %1421 = vrot.lane.b32.xlu0 %v2249_v3, %s2123_s28  ;;  %v1608_v3 = vld [vmem:[#allocation7 + $0x18] sm:$0xff] }
 0x8ea   :  { %v1958_v60 = vpack.c.bf16 %v1608_v3, %v1607_v58 }
 0x8ed   :  { %1583 = vrot.lane.b32.xlu0 %v1161_v24, %s2125_s30 }
 0x95c   :  { %v1413_v49 = vpop.xlane.xlu0 %1412 }
 0x95d   :  { %2014 = vrcp.f32 %v1413_v49 }
 0x960   :  { %v1416_v50 = vpop.xlane.xlu0 %1415 }
 0x961   :  { %2016 = vrcp.f32 %v1416_v50 }
 0x964   :  { %v1422_v51 = vpop.permute.xlu0 %1421 }
 0x965   :  { %1894 = vmatpush3.msra.mxu1 %v1422_v51 }
 0x966   :  { %1955 = vmatprep.subr.bf16.mxu1 %v1954_v59 }
 0x967   :  { %v2015_v52 = vpop.eup %2014 }
 0x968   :  { %v1419_v53 = vmul.f32 %v2015_v52, %v2011_v45  ;;  %v1584_v28 = vpop.permute.xlu0 %1583 }
 0x969   :  { %v1600_v12 = vsel %vm1599_vm6, %v1597_v30, %v1584_v28 }
 0x96a   :  { %1896 = vmatmul.mubr.msk.f32.vlgmr.msra.gmra.mrb[14].mxu1 %vm406_vm4, %v1419_v53 }
 0x96b   :  { %v2017_v54 = vpop.eup %2016  ;;  %1957 = vmatpush3.bf16.msra.mxu1 %v1954_v59 }
 0x96c   :  { %v1420_v55 = vmul.f32 %v2017_v54, %v2013_v47  ;;  %1959 = vmatprep.subr.bf16.mxu1 %v1958_v60 }
 0x96e   :  { %1901 = vmatmul.mubr.msk.f32.vlgmr.msra.gmra.mrb[20].mxu0 %vm406_vm4, %v1420_v55 }
 0x96f   :  { %1961 = vmatpush3.bf16.msra.mxu1 %v1958_v60 }
 0x970   :  { %1963 = vmatprep.subr.bf16.mxu1 %v1962_v63 }
 0x973   :  { %1965 = vmatpush3.bf16.msra.mxu1 %v1962_v63 }
 0x974   :  { %1967 = vmatprep.subr.bf16.mxu1 %v1966_v5 }
 0x977   :  { %1969 = vmatpush3.bf16.msra.mxu1 %v1966_v5 }
 0xa3d   :  { %v1493_v6 = vpop.f32.mrb[14].mxu1 }
 0xa3e   :  { %1591 = vrot.lane.b32.xlu0 %v1493_v6, %s2126_s5  ;;  %v1897_v7 = vpop.f32.mrb[15].mxu1 }
 0xa41   :  { %v1569_v8 = vpop.f32.mrb[20].mxu0 }
 0xa42   :  { %1593 = vrot.lane.b32.xlu1 %v1569_v8, %s2126_s5  ;;  %v1902_v9 = vpop.f32.mrb[21].mxu0 }
 0xab0   :  { %v1592_v13 = vpop.permute.xlu0 %1591 }
 0xab1   :  { %v1603_v15 = vsel %vm1602_vm5, %v1600_v12, %v1592_v13 }
 0xab2   :  { %1919 = vmatprep.mubr.msk.f32.mxu1 %vm85_vm0, %v1603_v15 }
 0xab4   :  { %v1594_v19 = vpop.permute.xlu1 %1593 }
 0xab5   :  { %v1604_v20 = vsel %vm1602_vm5, %v1601_v18, %v1594_v19 }
 0xab6   :  { %1920 = vmatmul.mubr.msk.f32.vlgmr.msra.gmra.mrb[16].mxu1 %vm85_vm0, %v1604_v20 }
 0xb89   :  { %v1921_v14 = vpop.f32.mrb[16].mxu1 }
 0xb8a   :  { %v1698_v22 = vadd.f32 %v1921_v14, %v1749_v21  ;;  %v1692_v27 = vpop.f32.mrb[17].mxu1 }
 0xb8b   :  { %v1693_v23 = vadd.f32 %v1749_v21, %v1692_v27 }
 0xb8c   :  { %1702 = vst.msk [vmem:[#allocation8 + $0x8] sm:$0xff] %vm85_vm0, %v1698_v22 }
 0xb8d   :  { %1701 = vst.msk [vmem:[#allocation8] sm:$0xff] %vm85_vm0, %v1693_v23 }
 0xb8e   :  { %2095 = shalt.err (!%p2092_p0)
}
 0xb8f   :  { %s2096_s12 = scalar_lea.hbm %s2403_s4, 256 }
 0xb90   :  { %p2097_p1 = scmp.ne.s32.totalorder %s2403_s4, %s2096_s12  ;;  %p2100_p2 = scmp.lt.u32.totalorder %s2096_s12, %s2403_s4 }
 0xb92   :  { %p2102_p3 = pnand %p2100_p2, %p2097_p1 }
 0xb94   :  { %2105 = shalt.err (!%p2102_p3)
}
 0xb95   :  { %1714 = dma.vmem_to_hbm [thread:$0]  %s1709_s9, 256, %s2403_s4, [#allocation4], %s2116_s1, %s2116_s1, %s2117_s13  }
 0xb96   :  { %2110 = dma.done.wait [#allocation4], 256  }
 0xb97   :  { %2111 = vsyncadd [#allocation4], 4294967040 }
 0xb98   :  { %1718 = vsyncpa [#allocation3], 1 }
 0xb99   :  { %1719 = vsyncpa [#allocation6], 1 }
 0xb9a   :  { %1720 = vsyncpa [#allocation4], 1 }

</bundles_post_ra>
